<compile_context>
chip_gen: v5e
topology: v5e:2x2
jax: 0.10.0
libtpu: 0.0.40
codegen_flags: <defaults>
</compile_context>

<pallas_src>
import jax
import jax.numpy as jnp
from jax.experimental import pallas as pl
from jax.experimental.pallas import tpu as pltpu


def se_kernel(x_ref, w1t_ref, w2t_ref, o_ref):
    # x block: (B, s, h) in the input dtype (do NOT upcast the whole slab).
    x = x_ref[...]                                                      # (B, s, h)

    # squeeze: mean over hidden dim, accumulated in f32.
    y = jnp.mean(x, axis=-1, dtype=jnp.float32)                         # (B, s)

    # excitation: Linear(s -> s//r, no bias) -> ReLU -> Linear(s//r -> s) -> Sigmoid.
    z = jnp.dot(y, w1t_ref[...], preferred_element_type=jnp.float32)    # (B, s//r)
    z = jnp.maximum(z, 0.0)
    g = jnp.dot(z, w2t_ref[...], preferred_element_type=jnp.float32)    # (B, s)
    g = jax.nn.sigmoid(g)

    # scale in the input dtype (bf16 multiply is native on v6e/v7x).
    o_ref[...] = (x * g.astype(x.dtype)[:, :, None]).astype(o_ref.dtype)


def se_layer(x, w1, w2, *, block_b=None):
    """x: (bs, s, h); w1: (s//r, s); w2: (s, s//r)  (PyTorch Linear weight layout)."""
    bs, s, h = x.shape
    sr = w1.shape[0]                      # s // r
    w1t = jnp.asarray(w1, jnp.float32).T  # (s, s//r)  gate math stays f32 (v5e safe)
    w2t = jnp.asarray(w2, jnp.float32).T  # (s//r, s)

    itemsize = int(jnp.dtype(x.dtype).itemsize)
    per_elem_bytes = s * h * itemsize

    if block_b is None:
        # Target ~2 MiB x-blocks so the DMA is near the HBM roofline and the
        # gate matmuls see M = B rows instead of M = 1.
        target_bytes = 2 << 20
        block_b = max(1, target_bytes // per_elem_bytes)
        block_b = min(block_b, bs)
        if bs >= 2:
            # Keep >= 2 grid steps so the parallel batch axis shards across cores.
            block_b = min(block_b, max(1, bs // 2))
    block_b = int(block_b)
    grid_b = pl.cdiv(bs, block_b)

    # VMEM budget: double-buffered input + output blocks + resident weights,
    # plus headroom. Capped to stay within v7x's 64 MiB physical VMEM.
    block_bytes = block_b * per_elem_bytes
    w_bytes = 2 * (s * sr) * 4
    vmem_needed = 2 * 2 * block_bytes + 2 * w_bytes + (2 << 20)
    vmem_limit = int(min(64 << 20, max(vmem_needed, 16 << 20)))

    cost = pl.CostEstimate(
        flops=2 * bs * s * h + 4 * bs * s * sr,        # mean + scale + two matmuls
        transcendentals=bs * s,                        # sigmoid
        bytes_accessed=2 * bs * s * h * itemsize + 2 * w_bytes,
    )

    return pl.pallas_call(
        se_kernel,
        out_shape=jax.ShapeDtypeStruct((bs, s, h), x.dtype),
        grid=(grid_b,),
        in_specs=[
            pl.BlockSpec((block_b, s, h), lambda b: (b, 0, 0)),
            pl.BlockSpec((s, sr), lambda b: (0, 0)),   # resident weights
            pl.BlockSpec((sr, s), lambda b: (0, 0)),
        ],
        out_specs=pl.BlockSpec((block_b, s, h), lambda b: (b, 0, 0)),
        compiler_params=pltpu.CompilerParams(
            dimension_semantics=("parallel",),
            vmem_limit_bytes=vmem_limit,
        ),
        cost_estimate=cost,
    )(x, w1t, w2t)


def se_layer_ref(x, w1, w2):
    """Pure-JAX reference of the PyTorch forward."""
    y = jnp.mean(x.astype(jnp.float32), axis=-1)             # (bs, s)
    y = jnp.maximum(y @ w1.T.astype(jnp.float32), 0.0)
    y = jax.nn.sigmoid(y @ w2.T.astype(jnp.float32))
    return (x.astype(jnp.float32) * y[:, :, None]).astype(x.dtype)


if __name__ == "__main__":
    bs, s, h, r = 2, 8, 32, 4           # c == s == 8, c // r == 2

    key = jax.random.PRNGKey(0)
    kx, k1, k2 = jax.random.split(key, 3)

    x = jax.random.normal(kx, (bs, s, h), dtype=jnp.float32)
    # PyTorch Linear weight layout: (out_features, in_features)
    w1 = 0.1 * jax.random.normal(k1, (s // r, s), dtype=jnp.float32)
    w2 = 0.1 * jax.random.normal(k2, (s, s // r), dtype=jnp.float32)

    out = se_layer(x, w1, w2)
    out = jax.block_until_ready(out)

    ref = se_layer_ref(x, w1, w2)
    assert out.shape == (bs, s, h)
    assert jnp.allclose(out, ref, atol=1e-5, rtol=1e-5), "mismatch vs reference"

    print("KERNEL_OK")
</pallas_src>

<mosaic_0001>
module attributes {stable_mosaic.version = 11 : i64} {
  func.func @se_kernel(%arg0: i32, %arg1: memref<1x8x32xf32, #tpu.memory_space<vmem>>, %arg2: memref<8x2xf32, #tpu.memory_space<vmem>>, %arg3: memref<2x8xf32, #tpu.memory_space<vmem>>, %arg4: memref<1x8x32xf32, #tpu.memory_space<vmem>>) attributes {dimension_semantics = [#tpu.dimension_semantics<parallel>], iteration_bounds = array<i64: 2>, scalar_prefetch = 0 : i64, scratch_operands = 0 : i64, tpu.core_type = #tpu.core_type<tc>, window_params = [{transform_indices = @transform_0, window_bounds = array<i64: 1, 8, 32>}, {pipeline_mode = #tpu.pipeline_mode<synchronous>, transform_indices = @transform_1, window_bounds = array<i64: 8, 2>}, {pipeline_mode = #tpu.pipeline_mode<synchronous>, transform_indices = @transform_2, window_bounds = array<i64: 2, 8>}, {transform_indices = @transform_3, window_bounds = array<i64: 1, 8, 32>}]} {
    %c0 = arith.constant 0 : index
    %c0_0 = arith.constant 0 : index
    %c0_1 = arith.constant 0 : index
    %0 = vector.load %arg1[%c0, %c0_0, %c0_1] : memref<1x8x32xf32, #tpu.memory_space<vmem>>, vector<1x8x32xf32>
    %cst = arith.constant dense<0.000000e+00> : vector<1x8xf32>
    %1 = vector.multi_reduction <add>, %0, %cst [2] : vector<1x8x32xf32> to vector<1x8xf32>
    %cst_2 = arith.constant 3.200000e+01 : f32
    %2 = vector.broadcast %cst_2 : f32 to vector<1x8xf32>
    %3 = arith.divf %1, %2 : vector<1x8xf32>
    %c0_3 = arith.constant 0 : index
    %c0_4 = arith.constant 0 : index
    %4 = vector.load %arg2[%c0_3, %c0_4] : memref<8x2xf32, #tpu.memory_space<vmem>>, vector<8x2xf32>
    %cst_5 = arith.constant dense<0.000000e+00> : vector<1x2xf32>
    %5 = tpu.matmul %3, %4, %cst_5 {dimension_numbers = #tpu.dot_dimension_numbers<[1], [0], [0], [1], [0, 0, 1, 1], [], []>} : vector<1x8xf32>, vector<8x2xf32>, vector<1x2xf32> -> vector<1x2xf32>
    %cst_6 = arith.constant 0.000000e+00 : f32
    %6 = vector.broadcast %cst_6 : f32 to vector<1x2xf32>
    %7 = arith.maximumf %5, %6 : vector<1x2xf32>
    %c0_7 = arith.constant 0 : index
    %c0_8 = arith.constant 0 : index
    %8 = vector.load %arg3[%c0_7, %c0_8] : memref<2x8xf32, #tpu.memory_space<vmem>>, vector<2x8xf32>
    %cst_9 = arith.constant dense<0.000000e+00> : vector<1x8xf32>
    %9 = tpu.matmul %7, %8, %cst_9 {dimension_numbers = #tpu.dot_dimension_numbers<[1], [0], [0], [1], [0, 0, 1, 1], [], []>} : vector<1x2xf32>, vector<2x8xf32>, vector<1x8xf32> -> vector<1x8xf32>
    %10 = arith.negf %9 : vector<1x8xf32>
    %11 = math.exp %10 : vector<1x8xf32>
    %cst_10 = arith.constant 1.000000e+00 : f32
    %12 = vector.broadcast %cst_10 : f32 to vector<1x8xf32>
    %13 = arith.addf %12, %11 : vector<1x8xf32>
    %14 = arith.divf %12, %13 : vector<1x8xf32>
    %15 = vector.shape_cast %14 : vector<1x8xf32> to vector<1x8x1xf32>
    %16 = vector.broadcast %15 : vector<1x8x1xf32> to vector<1x8x32xf32>
    %17 = arith.mulf %0, %16 : vector<1x8x32xf32>
    %c0_11 = arith.constant 0 : index
    %c0_12 = arith.constant 0 : index
    %c0_13 = arith.constant 0 : index
    %18 = vector.load %arg4[%c0_11, %c0_12, %c0_13] : memref<1x8x32xf32, #tpu.memory_space<vmem>>, vector<1x8x32xf32>
    tpu.vector_store %arg4[%c0_11, %c0_12, %c0_13], %17 {strides = array<i32>} : memref<1x8x32xf32, #tpu.memory_space<vmem>>, vector<1x8x32xf32>,
    return
  }
  func.func @transform_0(%arg0: i32) -> (i32, i32, i32) {
    %c0_i32 = arith.constant 0 : i32
    %c0_i32_0 = arith.constant 0 : i32
    %c0_i32_1 = arith.constant 0 : i32
    return %arg0, %c0_i32, %c0_i32_0 : i32, i32, i32
  }
  func.func @transform_1(%arg0: i32) -> (i32, i32) {
    %c0_i32 = arith.constant 0 : i32
    %c0_i32_0 = arith.constant 0 : i32
    %c0_i32_1 = arith.constant 0 : i32
    return %c0_i32, %c0_i32_0 : i32, i32
  }
  func.func @transform_2(%arg0: i32) -> (i32, i32) {
    %c0_i32 = arith.constant 0 : i32
    %c0_i32_0 = arith.constant 0 : i32
    %c0_i32_1 = arith.constant 0 : i32
    return %c0_i32, %c0_i32_0 : i32, i32
  }
  func.func @transform_3(%arg0: i32) -> (i32, i32, i32) {
    %c0_i32 = arith.constant 0 : i32
    %c0_i32_0 = arith.constant 0 : i32
    %c0_i32_1 = arith.constant 0 : i32
    return %arg0, %c0_i32, %c0_i32_0 : i32, i32, i32
  }
}

</mosaic_0001>

<bundles_post_ra>
// kernel: tpu_custom_call.1
= control target key start
LH: loop header
LB: loop body
LE: loop exit
PB: predicated region body
PF: predicated region fallthrough
CT: control target
= control target key end

     0   :  { %8 = vsyncpa [#allocation3], 0  ;;  %s701_s0 = inlined_call_operand.hbm [shape: f32[2,8,32], index: 0, kind: input, shape index: {}]   ;;  %s702_s1 = inlined_call_operand.vmem [shape: f32[8,2], index: 1, kind: input, shape index: {}]   ;;  %s703_s2 = inlined_call_operand.vmem [shape: f32[2,8], index: 2, kind: input, shape index: {}]   ;;  %s704_s3 = inlined_call_operand.hbm [shape: f32[2,8,32], index: 3, kind: output, shape index: {}]  }
   0x1   :  { %10 = vsyncpa [#allocation3 + $0x1], 0 }
   0x2   :  { %11 = vsyncpa [#allocation4], 0 }
   0x3   :  { %13 = vsyncpa [#allocation4 + $0x1], 0  ;;  %s562_s12 = smov 0   ;;  %s564_s13 = smov 0  }
   0x4   :  { %s566_s14 = smov 0   ;;  %s568_s15 = smov 0  }
   0x5 LB: > { %s583_s16 = sadd.s32 4294967295, %s539_s15   ;;  %s373_s17 = sadd.s32 4294967294, %s539_s15   ;;  %s539_s15 = sphi %s568_s15, %s714_s15   ;;  %s535_s14 = sphi %s566_s14, %s713_s14   ;;  %s531_s13 = sphi %s564_s13, %s712_s13   ;;  %s527_s12 = sphi %s562_s12, %s711_s12  }
   0x6   : > { %s587_s18 = sadd.s32 1, %s539_s15   ;;  %s26_s19 = sadd.s32 1, %s535_s14 }
   0x7   : > { %s23_s20 = ssub.s32 %s539_s15, %s587_s18  ;;  %p33_p0 = scmp.ne.s32.totalorder %s535_s14, %s531_s13 }
   0x8   : > { %p24_p1 = scmp.eq.s32.totalorder %s23_s20, 0  ;;  %p34_p2 = scmp.eq.s32.totalorder %s539_s15, 0 }
   0x9   : > { %p39_p3 = scmp.ne.s32.totalorder %s531_s13, %s527_s12  ;;  %p40_p4 = scmp.eq.s32.totalorder %s583_s16, 0 }
   0xa   : > { %s599_s21 = scalar_select %p24_p1, %s535_s14, %s26_s19  }
   0xb   : > { %p601_p5 = por %p34_p2, %p33_p0  ;;  %p605_p6 = por %p40_p4, %p39_p3 }
   0xc   : > { %p105_p7 = scmp.eq.s32.totalorder %s583_s16, 1  ;;  %p111_p8 = scmp.eq.s32.totalorder %s373_s17, 1 }
   0xd   : > { %p401_p10 = scmp.lt.s32.totalorder %s539_s15, 2  ;;  %s137_s26 = sand.u32 1, %s535_s14  }
   0xe   : > { %p612_p11 = por %p105_p7, %p33_p0  ;;  %p616_p12 = por %p111_p8, %p39_p3 }
   0xf   : > { %s377_s27 = sshll.u32 %s539_s15, 3  ;;  %s376_s28 = sshll.u32 %s137_s26, 3 }
  0x10   : > { %s145_s4 = scalar_lea.hbm %s701_s0, %s377_s27  ;;  %s141_s6 = scalar_lea.vmem [#allocation2], %s376_s28 }
  0x11   : > { %s147_s5 = sshll.u32 %s145_s4, 4  ;;  %s149_s7 = sshll.u32 %s141_s6, 4  ;;  %s148_s5 = int_to_ptr.hbm [resolvable:$true] %s147_s5  ;;  %s150_s7 = int_to_ptr.vmem [resolvable:$true] %s149_s7 }
  0x12   : > { %p627_p13 = pnand %p401_p10, %p601_p5  ;;  %p378_p0 = scmp.ge.s32.totalorder %s539_s15, 1 }
  0x13   : > { %p154_p1 = scmp.lt.s32.totalorder %s539_s15, 3  ;;  %s138_s9 = scalar_lea.sflag [#allocation3], %s137_s26 }
  0x14   : > { %s443_s10 = sshra.s32 %s148_s5, 4  ;;  %p447_p3 = pneg %p627_p13  ;;  %s444_s10 = int_to_ptr.hbm [resolvable:$true] %s443_s10 }
  0x15   : > { %s445_s11 = scalar_lea.hbm %s444_s10, 8  ;;  %s450_s20 = scalar_lea.hbm %s701_s0, 16 }
  0x16   : > { %p446_p2 = scmp.ne.s32.totalorder %s444_s10, %s445_s11  ;;  %p451_p5 = scmp.lt.s32.totalorder %s444_s10, %s701_s0 }
  0x17   : > { %p452_p8 = scmp.lt.s32.totalorder %s450_s20, %s445_s11 }
  0x18   : > { %p448_p4 = pnand %p447_p3, %p446_p2 }
  0x19   : > { %p453_p10 = por %p452_p8, %p451_p5 }
  0x1a   : > { %p449_p7 = pneg %p448_p4 }
  0x1c   : > { %p454_p9 = pnand %p453_p10, %p449_p7 }
  0x1e   : > { %457 = shalt.err (!%p454_p9)
}
  0x1f   : > { %396 = dma.hbm_to_vmem [thread:$0]  (!%p627_p13), %s148_s5, 128, %s150_s7, %s138_s9  }
  0x20   : > { %p155_p2 = pnand %p378_p0, %p154_p1 }
  0x21   : > { %s648_s26 = sand.u32 (!%p155_p2), 1, %s531_s13  }
  0x22   : > { %158 = sbr.rel (%p155_p2) target bundleno = 566 (0x236), region = 32  ;;  %s379_s28 = sshll.u32 (!%p155_p2), %s648_s26, 3 }
  0x23   : > { %s161_s29 = scalar_lea.sflag (!%p155_p2), [#allocation3], %s648_s26  ;;  %s164_s30 = scalar_lea.vmem (!%p155_p2), [#allocation2], %s379_s28 }
  0x27   : > { %518 = dma.done.wait (%p605_p6), %s161_s29, 128  }
  0x28   : > { %520 = vsyncadd (%p605_p6), %s161_s29, 4294967168  ;;  %vm189_vm0 = vcmask 261120   ;;  %v188_v0 = vld [vmem:[%s164_s30] sm:$0xff]  ;;  %v541_v3 = vmov 32.0   ;;  %v203_v9 = vlaneseq  ;;  %vm206_vm2 = vcmask 64512   ;;  %s386_s7 = sshll.u32 %s583_s16, 3 }
  0x29   : > { %v190_v1 = vsel %vm189_vm0, %v188_v0, 0.0  ;;  %v201_v2 = vld [vmem:[%s702_s1] sm:$0xff]  ;;  %437 = vrcp.f32 %v541_v3  ;;  %vm235_vm3 = vcmask 1041408   ;;  %vm231_vm4 = vcmask 15360   ;;  %s298_s10 = scalar_lea.hbm %s704_s3, %s386_s7  ;;  %s187_s11 = scalar_lea.vmem [#allocation5], %s379_s28 }
  0x2a   : > { %191 = vadd.xlane.f32.xlu0 %v190_v1  ;;  %224 = vmatpush.msra.mxu0 %v201_v2  ;;  %v204_v11 = vand.u32 127, %v203_v9  ;;  %v230_v15 = vld [vmem:[%s703_s2] sm:$0x3]  ;;  %v280_v18 = vshrl.u32 %v203_v9, 7  ;;  %s300_s17 = sshll.u32 %s187_s11, 4  ;;  %s302_s19 = sshll.u32 %s298_s10, 4  ;;  %s301_s17 = int_to_ptr.vmem [resolvable:$true] %s300_s17  ;;  %s303_s19 = int_to_ptr.hbm [resolvable:$true] %s302_s19 }
  0x2b   : > { %382 = vmatpush.msk.msra.mxu1 %vm235_vm3, %v230_v15  ;;  %s288_s20 = scalar_lea.sflag [#allocation4], %s648_s26  ;;  %s487_s22 = sshra.s32 %s303_s19, 4  ;;  %s488_s22 = int_to_ptr.hbm [resolvable:$true] %s487_s22 }
  0x2c   : > { %436 = vset.pattern.permute.xlu0 %v280_v18  ;;  %s489_s27 = scalar_lea.hbm %s488_s22, 8  ;;  %s493_s28 = scalar_lea.hbm %s704_s3, 16 }
  0x2d   : > { %p490_p6 = scmp.ne.s32.totalorder %s488_s22, %s489_s27  ;;  %p494_p0 = scmp.lt.s32.totalorder %s488_s22, %s704_s3 }
  0x2e   : > { %p495_p1 = scmp.lt.s32.totalorder %s493_s28, %s489_s27 }
  0x2f   : > { %v438_v4 = vpop.eup %437  ;;  %p491_p9 = pnand %p490_p6, %p612_p11 }
  0x30   : > { %v194_v5 = vmul.f32 32.0, %v438_v4  ;;  %vm198_vm1 = vweird.f32 %v438_v4  ;;  %p496_p3 = por %p495_p1, %p494_p0 }
  0x31   : > { %p492_p13 = pneg %p491_p9 }
  0x32   : > { %v195_v6 = vsub.f32 1.0, %v194_v5 }
  0x33   : > { %p497_p4 = pnand %p496_p3, %p492_p13 }
  0x34   : > { %v196_v7 = vmul.f32 %v438_v4, %v195_v6 }
  0x36   : > { %v197_v8 = vadd.f32 %v438_v4, %v196_v7 }
  0x38   : > { %v199_v10 = vsel %vm198_vm1, %v438_v4, %v197_v8 }
  0x9d   : > { %v192_v12 = vpop.xlane.xlu0 %191 }
  0x9e   : > { %v200_v13 = vmul.f32 %v199_v10, %v192_v12 }
  0xa0   : > { %v205_v14 = vperm.slane %v200_v13, %v204_v11 }
  0xa2   : > { %381 = vmatmul.msk.f32.vlgmr.msra.gmra.mxu0 %vm206_vm2, %v205_v14 }
 0x11f   : > { %v226_v16 = vpop.f32.mrf.mxu0 }
 0x120   : > { %v229_v17 = vmax.f32 %v226_v16, 0.0 }
 0x122   : > { %383 = vmatmul.msk.f32.vlgmr.msra.gmra.mxu1 %vm231_vm4, %v229_v17 }
 0x19f   : > { %v256_v19 = vpop.f32.mrf.mxu1 }
 0x1a0   : > { %v384_v20 = vmul.f32 -1.442695, %v256_v19 }
 0x1a2   : > { %439 = vpow2.f32 %v384_v20 }
 0x1a8   : > { %v440_v21 = vpop.eup %439 }
 0x1a9   : > { %v262_v22 = vadd.f32 1.0, %v440_v21 }
 0x1ab   : > { %441 = vrcp.f32 %v262_v22  ;;  %v274_v26 = vand.u32 2147483648, %v262_v22  ;;  %v272_v28 = vand.u32 2147483647, %v262_v22  ;;  %vm268_vm6 = vweird.f32 %v262_v22 }
 0x1ad   : > { %v275_v30 = vor.u32 1.1754944e-38, %v274_v26  ;;  %vm273_vm8 = vcmp.eq.f32.partialorder %v272_v28, 8.507059e+37 }
 0x1b1   : > { %v442_v23 = vpop.eup %441 }
 0x1b2   : > { %v264_v24 = vmul.f32 %v442_v23, %v262_v22  ;;  %vm269_vm5 = vweird.f32 %v442_v23 }
 0x1b3   : > { %vm270_vm7 = vmor %vm268_vm6, %vm269_vm5 }
 0x1b4   : > { %v265_v25 = vsub.f32 1.0, %v264_v24 }
 0x1b6   : > { %v266_v27 = vmul.f32 %v442_v23, %v265_v25 }
 0x1b8   : > { %v267_v29 = vadd.f32 %v442_v23, %v266_v27 }
 0x1ba   : > { %v271_v31 = vsel %vm270_vm7, %v442_v23, %v267_v29 }
 0x1bb   : > { %v276_v32 = vsel %vm273_vm8, %v275_v30, %v271_v31 }
 0x1bc   : > { %v278_v33 = vperm.slane %v276_v32, 0 }
 0x1be   : > { %283 = vperm.xlu0 %436, %v278_v33  }
 0x230   : > { %v284_v34 = vpop.permute.xlu0 %283 }
 0x231   : > { %v285_v35 = vmul.f32 %v284_v34, %v188_v0 }
 0x233   : > { %286 = vst.msk [vmem:[%s187_s11] sm:$0xff] %vm189_vm0, %v285_v35 }
 0x234   : > { %500 = shalt.err (!%p497_p4)
}
 0x235   : > { %391 = dma.vmem_to_hbm [thread:$0]  (%p612_p11), %s301_s17, 128, %s303_s19, %s288_s20  }
 0x236 PF: > { %s314_s26 = sand.u32 1, %s527_s12   ;;  %p710_p7 = scmp.ge.s32.totalorder %s539_s15, 2 }
 0x237   : > { %s315_s5 = scalar_lea.sflag [#allocation4], %s314_s26 }
 0x238   : > { %p398_p5 = pnand %p710_p7, %p616_p12 }
 0x23a   : > { %p399_p8 = pneg %p398_p5 }
 0x23c   : > { %522 = dma.done.wait (%p399_p8), %s315_s5, 128  }
 0x23d   : > { %524 = vsyncadd (%p399_p8), %s315_s5, 4294967168  ;;  %p16_p10 = scmp.ge.s32.totalorder %s587_s18, 4   ;;  %s711_s12 = smov %s531_s13 }
 0x23e   : > { %s712_s13 = smov %s535_s14  ;;  %s713_s14 = smov %s599_s21 }
 0x23f   : > { %s714_s15 = smov %s587_s18  ;;  %18 = sbr.rel (!%p16_p10) target bundleno = 5 (0x5), region = 77 }
 0x244   :  { %321 = vsyncpa [#allocation3], 1 }
 0x245   :  { %323 = vsyncpa [#allocation3 + $0x1], 1 }
 0x246   :  { %324 = vsyncpa [#allocation4], 1 }
 0x247   :  { %326 = vsyncpa [#allocation4 + $0x1], 1 }

</bundles_post_ra>
